<compile_context>
chip_gen: v7x
topology: tpu7x:2x2x1
jax: 0.10.0
libtpu: 0.0.40
codegen_flags: <defaults>
</compile_context>

<pallas_src>
import functools

import jax
import jax.numpy as jnp
from jax.experimental import pallas as pl
from jax.experimental.pallas import tpu as pltpu


def _round_up(x, m):
    return ((x + m - 1) // m) * m


def _encoder_lstm_kernel(ids_ref, fused_ref, whh_ref, bias_ref,
                         h_out_ref, c_out_ref, xproj_scr,
                         *, seq_len, batch_pad, gate_pad):
    """Whole encoder forward in one kernel invocation (grid=(1,))."""
    S, Bp, Hk = seq_len, batch_pad, gate_pad
    Vp = fused_ref.shape[0]

    # ---- Phase 1 (non-recurrent): embedding gather + input projection fused
    #      into a single one-hot matmul against the pre-fused (Vp, 4*Hk) table.
    ids = ids_ref[...]                                           # (S*Bp, 1) int32
    iota_v = jax.lax.broadcasted_iota(jnp.int32, (S * Bp, Vp), 1)
    onehot = (iota_v == ids).astype(jnp.float32)                 # (S*Bp, Vp)
    xproj_scr[...] = (
        jnp.dot(onehot, fused_ref[...], preferred_element_type=jnp.float32)
        + bias_ref[...])                                         # (S*Bp, 4*Hk)

    # ---- Phase 2: sequential time recurrence; h/c live in registers.
    whh = whh_ref[...]                                           # (Hk, 4*Hk), loop-invariant

    def gates_to_hc(gates, c):
        # Activations on the full 4*Hk-lane vreg (EUP slot), then lane slices
        # (XLU slot) to pull out the individual gates (PyTorch order i, f, g, o).
        sig = jax.nn.sigmoid(gates)
        th = jnp.tanh(gates)
        i = sig[:, 0 * Hk:1 * Hk]
        f = sig[:, 1 * Hk:2 * Hk]
        g = th[:, 2 * Hk:3 * Hk]
        o = sig[:, 3 * Hk:4 * Hk]
        c_new = f * c + i * g
        h_new = o * jnp.tanh(c_new)
        return h_new, c_new

    # Peeled t=0: h0 == 0, so there is no h @ W_hh contribution on step 0.
    c0 = jnp.zeros((Bp, Hk), jnp.float32)
    h1, c1 = gates_to_hc(xproj_scr[pl.ds(0, Bp), :], c0)

    def step(t, carry):
        h, c = carry
        base = pl.multiple_of(t * Bp, Bp)
        gates = (xproj_scr[pl.ds(base, Bp), :]
                 + jnp.dot(h, whh, preferred_element_type=jnp.float32))
        return gates_to_hc(gates, c)

    h_final, c_final = jax.lax.fori_loop(1, S, step, (h1, c1), unroll=True)

    h_out_ref[...] = h_final
    c_out_ref[...] = c_final


def encoder_forward(x_ids, params):
    """Mirrors Encoder.forward: returns (hidden, cell, cell)."""
    emb_table = params["embedding"]          # (V, E)
    w_ih = params["w_ih"]                    # (4H, E), gate-major [i|f|g|o]
    w_hh = params["w_hh"]                    # (4H, H)
    bias = params["b_ih"] + params["b_hh"]   # (4H,)

    B, S = x_ids.shape
    V, E = emb_table.shape
    H = w_hh.shape[1]

    Bp = _round_up(max(B, 8), 8)      # pad batch to a full sublane set
    Hk = _round_up(H, 8)              # per-gate width inside the kernel
    Vp = _round_up(V, 128)            # vocab pad (clean MXU contraction dim)
    G = 4 * Hk                        # total gate lanes (=128 for H=32)

    # --- wrapper-side layout prep (all padding rows/columns are zero) ---
    ids_sb = jnp.zeros((S, Bp), jnp.int32).at[:, :B].set(x_ids.T.astype(jnp.int32))
    ids_col = ids_sb.reshape(S * Bp, 1)                     # row = s*Bp + b

    # Fuse embedding with W_ih once in XLA: fused[v] = embedding[v] @ W_ih^T.
    fused = jnp.dot(emb_table.astype(jnp.float32),
                    w_ih.T.astype(jnp.float32),
                    precision=jax.lax.Precision.HIGHEST)    # (V, 4H)
    fused_p = (jnp.zeros((Vp, 4, Hk), jnp.float32)
               .at[:V, :, :H].set(fused.reshape(V, 4, H))
               .reshape(Vp, G))

    whh_p = (jnp.zeros((Hk, 4, Hk), jnp.float32)
             .at[:H, :, :H].set(w_hh.T.astype(jnp.float32).reshape(H, 4, H))
             .reshape(Hk, G))

    bias_p = (jnp.zeros((4, Hk), jnp.float32)
              .at[:, :H].set(bias.astype(jnp.float32).reshape(4, H))
              .reshape(1, G))

    kernel = functools.partial(_encoder_lstm_kernel,
                               seq_len=S, batch_pad=Bp, gate_pad=Hk)

    h_p, c_p = pl.pallas_call(
        kernel,
        out_shape=(
            jax.ShapeDtypeStruct((Bp, Hk), jnp.float32),
            jax.ShapeDtypeStruct((Bp, Hk), jnp.float32),
        ),
        grid_spec=pltpu.PrefetchScalarGridSpec(
            num_scalar_prefetch=0,
            grid=(1,),
            in_specs=[
                pl.BlockSpec((S * Bp, 1), lambda i: (0, 0)),   # token ids
                pl.BlockSpec((Vp, G), lambda i: (0, 0)),       # fused emb @ W_ih^T
                pl.BlockSpec((Hk, G), lambda i: (0, 0)),       # W_hh^T (gate-major)
                pl.BlockSpec((1, G), lambda i: (0, 0)),        # b_ih + b_hh
            ],
            out_specs=[
                pl.BlockSpec((Bp, Hk), lambda i: (0, 0)),
                pl.BlockSpec((Bp, Hk), lambda i: (0, 0)),
            ],
            scratch_shapes=[
                pltpu.VMEM((S * Bp, G), jnp.float32),          # hoisted x-projection
            ],
        ),
        compiler_params=pltpu.CompilerParams(
            dimension_semantics=("arbitrary",)),
    )(ids_col, fused_p, whh_p, bias_p)

    hidden = h_p[:B, :H][None]   # (num_layers=1, B, H)
    cell = c_p[:B, :H][None]
    return hidden, cell, cell


def _reference_forward(x_ids, params):
    """Pure-JAX LSTM reference for validation."""
    emb = params["embedding"][x_ids]  # (B, S, E)
    B, S, E = emb.shape
    H = params["w_hh"].shape[1]
    w_ih, w_hh = params["w_ih"], params["w_hh"]
    b = params["b_ih"] + params["b_hh"]

    def step(carry, x_t):
        h, c = carry
        gates = x_t @ w_ih.T + h @ w_hh.T + b
        i = jax.nn.sigmoid(gates[:, 0 * H:1 * H])
        f = jax.nn.sigmoid(gates[:, 1 * H:2 * H])
        g = jnp.tanh(gates[:, 2 * H:3 * H])
        o = jax.nn.sigmoid(gates[:, 3 * H:4 * H])
        c_new = f * c + i * g
        h_new = o * jnp.tanh(c_new)
        return (h_new, c_new), None

    h0 = jnp.zeros((B, H), jnp.float32)
    c0 = jnp.zeros((B, H), jnp.float32)
    (h, c), _ = jax.lax.scan(step, (h0, c0), jnp.transpose(emb, (1, 0, 2)))
    return h[None], c[None], c[None]


def init_params(key, input_size, hidden_size, embedding_dim):
    k_emb, k_wih, k_whh, k_bih, k_bhh = jax.random.split(key, 5)
    scale = 1.0 / jnp.sqrt(hidden_size)
    return {
        "embedding": jax.random.normal(k_emb, (input_size, embedding_dim),
                                       jnp.float32),
        "w_ih": jax.random.uniform(k_wih, (4 * hidden_size, embedding_dim),
                                   jnp.float32, -scale, scale),
        "w_hh": jax.random.uniform(k_whh, (4 * hidden_size, hidden_size),
                                   jnp.float32, -scale, scale),
        "b_ih": jax.random.uniform(k_bih, (4 * hidden_size,),
                                   jnp.float32, -scale, scale),
        "b_hh": jax.random.uniform(k_bhh, (4 * hidden_size,),
                                   jnp.float32, -scale, scale),
    }


if __name__ == "__main__":
    INPUT_SIZE = 50      # vocab
    HIDDEN_SIZE = 32
    EMBEDDING_DIM = 16
    BATCH = 2
    SEQ = 8

    root = jax.random.PRNGKey(0)
    k_param, k_data = jax.random.split(root)
    params = init_params(k_param, INPUT_SIZE, HIDDEN_SIZE, EMBEDDING_DIM)
    x_ids = jax.random.randint(k_data, (BATCH, SEQ), 0, INPUT_SIZE,
                               dtype=jnp.int32)

    hidden, cell, cell2 = encoder_forward(x_ids, params)
    jax.block_until_ready((hidden, cell, cell2))

    # Validate against a pure-JAX reference.
    h_ref, c_ref, _ = _reference_forward(x_ids, params)
    assert hidden.shape == (1, BATCH, HIDDEN_SIZE)
    assert cell.shape == (1, BATCH, HIDDEN_SIZE)
    assert jnp.allclose(hidden, h_ref, atol=1e-5, rtol=1e-5)
    assert jnp.allclose(cell, c_ref, atol=1e-5, rtol=1e-5)

    print("KERNEL_OK")
</pallas_src>

<mosaic_0001>
module attributes {stable_mosaic.version = 11 : i64} {
  func.func @_encoder_lstm_kernel(%arg0: i32, %arg1: memref<64x1xi32, #tpu.memory_space<vmem>>, %arg2: memref<128x128xf32, #tpu.memory_space<vmem>>, %arg3: memref<32x128xf32, #tpu.memory_space<vmem>>, %arg4: memref<1x128xf32, #tpu.memory_space<vmem>>, %arg5: memref<8x32xf32, #tpu.memory_space<vmem>>, %arg6: memref<8x32xf32, #tpu.memory_space<vmem>>, %arg7: memref<64x128xf32, #tpu.memory_space<vmem>>) attributes {dimension_semantics = [#tpu.dimension_semantics<arbitrary>], iteration_bounds = array<i64: 1>, scalar_prefetch = 0 : i64, scratch_operands = 1 : i64, tpu.core_type = #tpu.core_type<tc>, window_params = [{pipeline_mode = #tpu.pipeline_mode<synchronous>, transform_indices = @transform_0, window_bounds = array<i64: 64, 1>}, {pipeline_mode = #tpu.pipeline_mode<synchronous>, transform_indices = @transform_1, window_bounds = array<i64: 128, 128>}, {pipeline_mode = #tpu.pipeline_mode<synchronous>, transform_indices = @transform_2, window_bounds = array<i64: 32, 128>}, {pipeline_mode = #tpu.pipeline_mode<synchronous>, transform_indices = @transform_3, window_bounds = array<i64: 1, 128>}, {pipeline_mode = #tpu.pipeline_mode<synchronous>, transform_indices = @transform_4, window_bounds = array<i64: 8, 32>}, {pipeline_mode = #tpu.pipeline_mode<synchronous>, transform_indices = @transform_5, window_bounds = array<i64: 8, 32>}]} {
    %c0 = arith.constant 0 : index
    %c0_0 = arith.constant 0 : index
    %0 = vector.load %arg1[%c0, %c0_0] : memref<64x1xi32, #tpu.memory_space<vmem>>, vector<64x1xi32>
    %1 = tpu.iota {dimensions = array<i32: 1>} : vector<64x128xi32>
    %2 = vector.broadcast %0 : vector<64x1xi32> to vector<64x128xi32>
    %3 = arith.cmpi eq, %1, %2 : vector<64x128xi32>
    %4 = arith.extui %3 : vector<64x128xi1> to vector<64x128xi32>
    %5 = arith.sitofp %4 : vector<64x128xi32> to vector<64x128xf32>
    %c0_1 = arith.constant 0 : index
    %c0_2 = arith.constant 0 : index
    %6 = vector.load %arg2[%c0_1, %c0_2] : memref<128x128xf32, #tpu.memory_space<vmem>>, vector<128x128xf32>
    %cst = arith.constant dense<0.000000e+00> : vector<64x128xf32>
    %7 = tpu.matmul %5, %6, %cst {dimension_numbers = #tpu.dot_dimension_numbers<[1], [0], [0], [1], [0, 0, 1, 1], [], []>} : vector<64x128xf32>, vector<128x128xf32>, vector<64x128xf32> -> vector<64x128xf32>
    %c0_3 = arith.constant 0 : index
    %c0_4 = arith.constant 0 : index
    %8 = vector.load %arg4[%c0_3, %c0_4] : memref<1x128xf32, #tpu.memory_space<vmem>>, vector<1x128xf32>
    %9 = vector.broadcast %8 : vector<1x128xf32> to vector<64x128xf32>
    %10 = arith.addf %7, %9 : vector<64x128xf32>
    %c0_5 = arith.constant 0 : index
    %c0_6 = arith.constant 0 : index
    %11 = vector.load %arg7[%c0_5, %c0_6] : memref<64x128xf32, #tpu.memory_space<vmem>>, vector<64x128xf32>
    tpu.vector_store %arg7[%c0_5, %c0_6], %10 {strides = array<i32>} : memref<64x128xf32, #tpu.memory_space<vmem>>, vector<64x128xf32>,
    %c0_7 = arith.constant 0 : index
    %c0_8 = arith.constant 0 : index
    %12 = vector.load %arg3[%c0_7, %c0_8] : memref<32x128xf32, #tpu.memory_space<vmem>>, vector<32x128xf32>
    %cst_9 = arith.constant 0.000000e+00 : f32
    %13 = vector.broadcast %cst_9 : f32 to vector<8x32xf32>
    %c0_10 = arith.constant 0 : index
    %c0_11 = arith.constant 0 : index
    %14 = vector.load %arg7[%c0_10, %c0_11] : memref<64x128xf32, #tpu.memory_space<vmem>>, vector<8x128xf32>
    %15 = arith.negf %14 : vector<8x128xf32>
    %16 = math.exp %15 : vector<8x128xf32>
    %cst_12 = arith.constant 1.000000e+00 : f32
    %17 = vector.broadcast %cst_12 : f32 to vector<8x128xf32>
    %18 = arith.addf %17, %16 : vector<8x128xf32>
    %19 = arith.divf %17, %18 : vector<8x128xf32>
    %20 = math.tanh %14 : vector<8x128xf32>
    %21 = vector.extract_strided_slice %19 {offsets = [0, 0], sizes = [8, 32], strides = [1, 1]} : vector<8x128xf32> to vector<8x32xf32>
    %22 = vector.extract_strided_slice %19 {offsets = [0, 32], sizes = [8, 32], strides = [1, 1]} : vector<8x128xf32> to vector<8x32xf32>
    %23 = vector.extract_strided_slice %20 {offsets = [0, 64], sizes = [8, 32], strides = [1, 1]} : vector<8x128xf32> to vector<8x32xf32>
    %24 = vector.extract_strided_slice %19 {offsets = [0, 96], sizes = [8, 32], strides = [1, 1]} : vector<8x128xf32> to vector<8x32xf32>
    %25 = arith.mulf %22, %13 : vector<8x32xf32>
    %26 = arith.mulf %21, %23 : vector<8x32xf32>
    %27 = arith.addf %25, %26 : vector<8x32xf32>
    %28 = math.tanh %27 : vector<8x32xf32>
    %29 = arith.mulf %24, %28 : vector<8x32xf32>
    %c1_i32 = arith.constant 1 : i32
    %c8_i32 = arith.constant 8 : i32
    %30 = arith.muli %c1_i32, %c8_i32 : i32
    %31 = tpu.assume_multiple %30, 8 : i32
    %32 = arith.index_cast %31 : i32 to index
    %c0_13 = arith.constant 0 : index
    %33 = vector.load %arg7[%32, %c0_13] : memref<64x128xf32, #tpu.memory_space<vmem>>, vector<8x128xf32>
    %cst_14 = arith.constant dense<0.000000e+00> : vector<8x128xf32>
    %34 = tpu.matmul %29, %12, %cst_14 {dimension_numbers = #tpu.dot_dimension_numbers<[1], [0], [0], [1], [0, 0, 1, 1], [], []>} : vector<8x32xf32>, vector<32x128xf32>, vector<8x128xf32> -> vector<8x128xf32>
    %35 = arith.addf %33, %34 : vector<8x128xf32>
    %36 = arith.negf %35 : vector<8x128xf32>
    %37 = math.exp %36 : vector<8x128xf32>
    %cst_15 = arith.constant 1.000000e+00 : f32
    %38 = vector.broadcast %cst_15 : f32 to vector<8x128xf32>
    %39 = arith.addf %38, %37 : vector<8x128xf32>
    %40 = arith.divf %38, %39 : vector<8x128xf32>
    %41 = math.tanh %35 : vector<8x128xf32>
    %42 = vector.extract_strided_slice %40 {offsets = [0, 0], sizes = [8, 32], strides = [1, 1]} : vector<8x128xf32> to vector<8x32xf32>
    %43 = vector.extract_strided_slice %40 {offsets = [0, 32], sizes = [8, 32], strides = [1, 1]} : vector<8x128xf32> to vector<8x32xf32>
    %44 = vector.extract_strided_slice %41 {offsets = [0, 64], sizes = [8, 32], strides = [1, 1]} : vector<8x128xf32> to vector<8x32xf32>
    %45 = vector.extract_strided_slice %40 {offsets = [0, 96], sizes = [8, 32], strides = [1, 1]} : vector<8x128xf32> to vector<8x32xf32>
    %46 = arith.mulf %43, %27 : vector<8x32xf32>
    %47 = arith.mulf %42, %44 : vector<8x32xf32>
    %48 = arith.addf %46, %47 : vector<8x32xf32>
    %49 = math.tanh %48 : vector<8x32xf32>
    %50 = arith.mulf %45, %49 : vector<8x32xf32>
    %c2_i32 = arith.constant 2 : i32
    %c8_i32_16 = arith.constant 8 : i32
    %51 = arith.muli %c2_i32, %c8_i32_16 : i32
    %52 = tpu.assume_multiple %51, 8 : i32
    %53 = arith.index_cast %52 : i32 to index
    %c0_17 = arith.constant 0 : index
    %54 = vector.load %arg7[%53, %c0_17] : memref<64x128xf32, #tpu.memory_space<vmem>>, vector<8x128xf32>
    %cst_18 = arith.constant dense<0.000000e+00> : vector<8x128xf32>
    %55 = tpu.matmul %50, %12, %cst_18 {dimension_numbers = #tpu.dot_dimension_numbers<[1], [0], [0], [1], [0, 0, 1, 1], [], []>} : vector<8x32xf32>, vector<32x128xf32>, vector<8x128xf32> -> vector<8x128xf32>
    %56 = arith.addf %54, %55 : vector<8x128xf32>
    %57 = arith.negf %56 : vector<8x128xf32>
    %58 = math.exp %57 : vector<8x128xf32>
    %cst_19 = arith.constant 1.000000e+00 : f32
    %59 = vector.broadcast %cst_19 : f32 to vector<8x128xf32>
    %60 = arith.addf %59, %58 : vector<8x128xf32>
    %61 = arith.divf %59, %60 : vector<8x128xf32>
    %62 = math.tanh %56 : vector<8x128xf32>
    %63 = vector.extract_strided_slice %61 {offsets = [0, 0], sizes = [8, 32], strides = [1, 1]} : vector<8x128xf32> to vector<8x32xf32>
    %64 = vector.extract_strided_slice %61 {offsets = [0, 32], sizes = [8, 32], strides = [1, 1]} : vector<8x128xf32> to vector<8x32xf32>
    %65 = vector.extract_strided_slice %62 {offsets = [0, 64], sizes = [8, 32], strides = [1, 1]} : vector<8x128xf32> to vector<8x32xf32>
    %66 = vector.extract_strided_slice %61 {offsets = [0, 96], sizes = [8, 32], strides = [1, 1]} : vector<8x128xf32> to vector<8x32xf32>
    %67 = arith.mulf %64, %48 : vector<8x32xf32>
    %68 = arith.mulf %63, %65 : vector<8x32xf32>
    %69 = arith.addf %67, %68 : vector<8x32xf32>
    %70 = math.tanh %69 : vector<8x32xf32>
    %71 = arith.mulf %66, %70 : vector<8x32xf32>
    %c3_i32 = arith.constant 3 : i32
    %c8_i32_20 = arith.constant 8 : i32
    %72 = arith.muli %c3_i32, %c8_i32_20 : i32
    %73 = tpu.assume_multiple %72, 8 : i32
    %74 = arith.index_cast %73 : i32 to index
    %c0_21 = arith.constant 0 : index
    %75 = vector.load %arg7[%74, %c0_21] : memref<64x128xf32, #tpu.memory_space<vmem>>, vector<8x128xf32>
    %cst_22 = arith.constant dense<0.000000e+00> : vector<8x128xf32>
    %76 = tpu.matmul %71, %12, %cst_22 {dimension_numbers = #tpu.dot_dimension_numbers<[1], [0], [0], [1], [0, 0, 1, 1], [], []>} : vector<8x32xf32>, vector<32x128xf32>, vector<8x128xf32> -> vector<8x128xf32>
    %77 = arith.addf %75, %76 : vector<8x128xf32>
    %78 = arith.negf %77 : vector<8x128xf32>
    %79 = math.exp %78 : vector<8x128xf32>
    %cst_23 = arith.constant 1.000000e+00 : f32
    %80 = vector.broadcast %cst_23 : f32 to vector<8x128xf32>
    %81 = arith.addf %80, %79 : vector<8x128xf32>
    %82 = arith.divf %80, %81 : vector<8x128xf32>
    %83 = math.tanh %77 : vector<8x128xf32>
    %84 = vector.extract_strided_slice %82 {offsets = [0, 0], sizes = [8, 32], strides = [1, 1]} : vector<8x128xf32> to vector<8x32xf32>
    %85 = vector.extract_strided_slice %82 {offsets = [0, 32], sizes = [8, 32], strides = [1, 1]} : vector<8x128xf32> to vector<8x32xf32>
    %86 = vector.extract_strided_slice %83 {offsets = [0, 64], sizes = [8, 32], strides = [1, 1]} : vector<8x128xf32> to vector<8x32xf32>
    %87 = vector.extract_strided_slice %82 {offsets = [0, 96], sizes = [8, 32], strides = [1, 1]} : vector<8x128xf32> to vector<8x32xf32>
    %88 = arith.mulf %85, %69 : vector<8x32xf32>
    %89 = arith.mulf %84, %86 : vector<8x32xf32>
    %90 = arith.addf %88, %89 : vector<8x32xf32>
    %91 = math.tanh %90 : vector<8x32xf32>
    %92 = arith.mulf %87, %91 : vector<8x32xf32>
    %c4_i32 = arith.constant 4 : i32
    %c8_i32_24 = arith.constant 8 : i32
    %93 = arith.muli %c4_i32, %c8_i32_24 : i32
    %94 = tpu.assume_multiple %93, 8 : i32
    %95 = arith.index_cast %94 : i32 to index
    %c0_25 = arith.constant 0 : index
    %96 = vector.load %arg7[%95, %c0_25] : memref<64x128xf32, #tpu.memory_space<vmem>>, vector<8x128xf32>
    %cst_26 = arith.constant dense<0.000000e+00> : vector<8x128xf32>
    %97 = tpu.matmul %92, %12, %cst_26 {dimension_numbers = #tpu.dot_dimension_numbers<[1], [0], [0], [1], [0, 0, 1, 1], [], []>} : vector<8x32xf32>, vector<32x128xf32>, vector<8x128xf32> -> vector<8x128xf32>
    %98 = arith.addf %96, %97 : vector<8x128xf32>
    %99 = arith.negf %98 : vector<8x128xf32>
    %100 = math.exp %99 : vector<8x128xf32>
    %cst_27 = arith.constant 1.000000e+00 : f32
    %101 = vector.broadcast %cst_27 : f32 to vector<8x128xf32>
    %102 = arith.addf %101, %100 : vector<8x128xf32>
    %103 = arith.divf %101, %102 : vector<8x128xf32>
    %104 = math.tanh %98 : vector<8x128xf32>
    %105 = vector.extract_strided_slice %103 {offsets = [0, 0], sizes = [8, 32], strides = [1, 1]} : vector<8x128xf32> to vector<8x32xf32>
    %106 = vector.extract_strided_slice %103 {offsets = [0, 32], sizes = [8, 32], strides = [1, 1]} : vector<8x128xf32> to vector<8x32xf32>
    %107 = vector.extract_strided_slice %104 {offsets = [0, 64], sizes = [8, 32], strides = [1, 1]} : vector<8x128xf32> to vector<8x32xf32>
    %108 = vector.extract_strided_slice %103 {offsets = [0, 96], sizes = [8, 32], strides = [1, 1]} : vector<8x128xf32> to vector<8x32xf32>
    %109 = arith.mulf %106, %90 : vector<8x32xf32>
    %110 = arith.mulf %105, %107 : vector<8x32xf32>
    %111 = arith.addf %109, %110 : vector<8x32xf32>
    %112 = math.tanh %111 : vector<8x32xf32>
    %113 = arith.mulf %108, %112 : vector<8x32xf32>
    %c5_i32 = arith.constant 5 : i32
    %c8_i32_28 = arith.constant 8 : i32
    %114 = arith.muli %c5_i32, %c8_i32_28 : i32
    %115 = tpu.assume_multiple %114, 8 : i32
    %116 = arith.index_cast %115 : i32 to index
    %c0_29 = arith.constant 0 : index
    %117 = vector.load %arg7[%116, %c0_29] : memref<64x128xf32, #tpu.memory_space<vmem>>, vector<8x128xf32>
    %cst_30 = arith.constant dense<0.000000e+00> : vector<8x128xf32>
    %118 = tpu.matmul %113, %12, %cst_30 {dimension_numbers = #tpu.dot_dimension_numbers<[1], [0], [0], [1], [0, 0, 1, 1], [], []>} : vector<8x32xf32>, vector<32x128xf32>, vector<8x128xf32> -> vector<8x128xf32>
    %119 = arith.addf %117, %118 : vector<8x128xf32>
    %120 = arith.negf %119 : vector<8x128xf32>
    %121 = math.exp %120 : vector<8x128xf32>
    %cst_31 = arith.constant 1.000000e+00 : f32
    %122 = vector.broadcast %cst_31 : f32 to vector<8x128xf32>
    %123 = arith.addf %122, %121 : vector<8x128xf32>
    %124 = arith.divf %122, %123 : vector<8x128xf32>
    %125 = math.tanh %119 : vector<8x128xf32>
    %126 = vector.extract_strided_slice %124 {offsets = [0, 0], sizes = [8, 32], strides = [1, 1]} : vector<8x128xf32> to vector<8x32xf32>
    %127 = vector.extract_strided_slice %124 {offsets = [0, 32], sizes = [8, 32], strides = [1, 1]} : vector<8x128xf32> to vector<8x32xf32>
    %128 = vector.extract_strided_slice %125 {offsets = [0, 64], sizes = [8, 32], strides = [1, 1]} : vector<8x128xf32> to vector<8x32xf32>
    %129 = vector.extract_strided_slice %124 {offsets = [0, 96], sizes = [8, 32], strides = [1, 1]} : vector<8x128xf32> to vector<8x32xf32>
    %130 = arith.mulf %127, %111 : vector<8x32xf32>
    %131 = arith.mulf %126, %128 : vector<8x32xf32>
    %132 = arith.addf %130, %131 : vector<8x32xf32>
    %133 = math.tanh %132 : vector<8x32xf32>
    %134 = arith.mulf %129, %133 : vector<8x32xf32>
    %c6_i32 = arith.constant 6 : i32
    %c8_i32_32 = arith.constant 8 : i32
    %135 = arith.muli %c6_i32, %c8_i32_32 : i32
    %136 = tpu.assume_multiple %135, 8 : i32
    %137 = arith.index_cast %136 : i32 to index
    %c0_33 = arith.constant 0 : index
    %138 = vector.load %arg7[%137, %c0_33] : memref<64x128xf32, #tpu.memory_space<vmem>>, vector<8x128xf32>
    %cst_34 = arith.constant dense<0.000000e+00> : vector<8x128xf32>
    %139 = tpu.matmul %134, %12, %cst_34 {dimension_numbers = #tpu.dot_dimension_numbers<[1], [0], [0], [1], [0, 0, 1, 1], [], []>} : vector<8x32xf32>, vector<32x128xf32>, vector<8x128xf32> -> vector<8x128xf32>
    %140 = arith.addf %138, %139 : vector<8x128xf32>
    %141 = arith.negf %140 : vector<8x128xf32>
    %142 = math.exp %141 : vector<8x128xf32>
    %cst_35 = arith.constant 1.000000e+00 : f32
    %143 = vector.broadcast %cst_35 : f32 to vector<8x128xf32>
    %144 = arith.addf %143, %142 : vector<8x128xf32>
    %145 = arith.divf %143, %144 : vector<8x128xf32>
    %146 = math.tanh %140 : vector<8x128xf32>
    %147 = vector.extract_strided_slice %145 {offsets = [0, 0], sizes = [8, 32], strides = [1, 1]} : vector<8x128xf32> to vector<8x32xf32>
    %148 = vector.extract_strided_slice %145 {offsets = [0, 32], sizes = [8, 32], strides = [1, 1]} : vector<8x128xf32> to vector<8x32xf32>
    %149 = vector.extract_strided_slice %146 {offsets = [0, 64], sizes = [8, 32], strides = [1, 1]} : vector<8x128xf32> to vector<8x32xf32>
    %150 = vector.extract_strided_slice %145 {offsets = [0, 96], sizes = [8, 32], strides = [1, 1]} : vector<8x128xf32> to vector<8x32xf32>
    %151 = arith.mulf %148, %132 : vector<8x32xf32>
    %152 = arith.mulf %147, %149 : vector<8x32xf32>
    %153 = arith.addf %151, %152 : vector<8x32xf32>
    %154 = math.tanh %153 : vector<8x32xf32>
    %155 = arith.mulf %150, %154 : vector<8x32xf32>
    %c7_i32 = arith.constant 7 : i32
    %c8_i32_36 = arith.constant 8 : i32
    %156 = arith.muli %c7_i32, %c8_i32_36 : i32
    %157 = tpu.assume_multiple %156, 8 : i32
    %158 = arith.index_cast %157 : i32 to index
    %c0_37 = arith.constant 0 : index
    %159 = vector.load %arg7[%158, %c0_37] : memref<64x128xf32, #tpu.memory_space<vmem>>, vector<8x128xf32>
    %cst_38 = arith.constant dense<0.000000e+00> : vector<8x128xf32>
    %160 = tpu.matmul %155, %12, %cst_38 {dimension_numbers = #tpu.dot_dimension_numbers<[1], [0], [0], [1], [0, 0, 1, 1], [], []>} : vector<8x32xf32>, vector<32x128xf32>, vector<8x128xf32> -> vector<8x128xf32>
    %161 = arith.addf %159, %160 : vector<8x128xf32>
    %162 = arith.negf %161 : vector<8x128xf32>
    %163 = math.exp %162 : vector<8x128xf32>
    %cst_39 = arith.constant 1.000000e+00 : f32
    %164 = vector.broadcast %cst_39 : f32 to vector<8x128xf32>
    %165 = arith.addf %164, %163 : vector<8x128xf32>
    %166 = arith.divf %164, %165 : vector<8x128xf32>
    %167 = math.tanh %161 : vector<8x128xf32>
    %168 = vector.extract_strided_slice %166 {offsets = [0, 0], sizes = [8, 32], strides = [1, 1]} : vector<8x128xf32> to vector<8x32xf32>
    %169 = vector.extract_strided_slice %166 {offsets = [0, 32], sizes = [8, 32], strides = [1, 1]} : vector<8x128xf32> to vector<8x32xf32>
    %170 = vector.extract_strided_slice %167 {offsets = [0, 64], sizes = [8, 32], strides = [1, 1]} : vector<8x128xf32> to vector<8x32xf32>
    %171 = vector.extract_strided_slice %166 {offsets = [0, 96], sizes = [8, 32], strides = [1, 1]} : vector<8x128xf32> to vector<8x32xf32>
    %172 = arith.mulf %169, %153 : vector<8x32xf32>
    %173 = arith.mulf %168, %170 : vector<8x32xf32>
    %174 = arith.addf %172, %173 : vector<8x32xf32>
    %175 = math.tanh %174 : vector<8x32xf32>
    %176 = arith.mulf %171, %175 : vector<8x32xf32>
    %c7_i32_40 = arith.constant 7 : i32
    %c0_41 = arith.constant 0 : index
    %c0_42 = arith.constant 0 : index
    %177 = vector.load %arg5[%c0_41, %c0_42] : memref<8x32xf32, #tpu.memory_space<vmem>>, vector<8x32xf32>
    tpu.vector_store %arg5[%c0_41, %c0_42], %176 {strides = array<i32>} : memref<8x32xf32, #tpu.memory_space<vmem>>, vector<8x32xf32>,
    %c0_43 = arith.constant 0 : index
    %c0_44 = arith.constant 0 : index
    %178 = vector.load %arg6[%c0_43, %c0_44] : memref<8x32xf32, #tpu.memory_space<vmem>>, vector<8x32xf32>
    tpu.vector_store %arg6[%c0_43, %c0_44], %174 {strides = array<i32>} : memref<8x32xf32, #tpu.memory_space<vmem>>, vector<8x32xf32>,
    return
  }
  func.func @transform_0(%arg0: i32) -> (i32, i32) {
    %c0_i32 = arith.constant 0 : i32
    %c0_i32_0 = arith.constant 0 : i32
    %c0_i32_1 = arith.constant 0 : i32
    return %c0_i32, %c0_i32_0 : i32, i32
  }
  func.func @transform_1(%arg0: i32) -> (i32, i32) {
    %c0_i32 = arith.constant 0 : i32
    %c0_i32_0 = arith.constant 0 : i32
    %c0_i32_1 = arith.constant 0 : i32
    return %c0_i32, %c0_i32_0 : i32, i32
  }
  func.func @transform_2(%arg0: i32) -> (i32, i32) {
    %c0_i32 = arith.constant 0 : i32
    %c0_i32_0 = arith.constant 0 : i32
    %c0_i32_1 = arith.constant 0 : i32
    return %c0_i32, %c0_i32_0 : i32, i32
  }
  func.func @transform_3(%arg0: i32) -> (i32, i32) {
    %c0_i32 = arith.constant 0 : i32
    %c0_i32_0 = arith.constant 0 : i32
    %c0_i32_1 = arith.constant 0 : i32
    return %c0_i32, %c0_i32_0 : i32, i32
  }
  func.func @transform_4(%arg0: i32) -> (i32, i32) {
    %c0_i32 = arith.constant 0 : i32
    %c0_i32_0 = arith.constant 0 : i32
    %c0_i32_1 = arith.constant 0 : i32
    return %c0_i32, %c0_i32_0 : i32, i32
  }
  func.func @transform_5(%arg0: i32) -> (i32, i32) {
    %c0_i32 = arith.constant 0 : i32
    %c0_i32_0 = arith.constant 0 : i32
    %c0_i32_1 = arith.constant 0 : i32
    return %c0_i32, %c0_i32_0 : i32, i32
  }
}

</mosaic_0001>

<bundles_post_ra>
// kernel: tpu_custom_call.1
= control target key start
LH: loop header
LB: loop body
LE: loop exit
PB: predicated region body
PF: predicated region fallthrough
CT: control target
= control target key end

     0   :  { %11 = vsyncpa [#allocation4], 0  ;;  %s1682_s0 = inlined_call_operand.vmem [shape: s32[64,1], index: 0, kind: input, shape index: {}]   ;;  %s1683_s1 = inlined_call_operand.hbm [shape: f32[128,128], index: 1, kind: input, shape index: {}]   ;;  %s1684_s2 = inlined_call_operand.vmem [shape: f32[32,128], index: 2, kind: input, shape index: {}]   ;;  %s1685_s3 = inlined_call_operand.vmem [shape: f32[1,128], index: 3, kind: input, shape index: {}]   ;;  %s1686_s4 = inlined_call_operand.hbm [shape: f32[8,32], index: 4, kind: output, shape index: {0}]   ;;  %s1687_s5 = inlined_call_operand.hbm [shape: f32[8,32], index: 5, kind: output, shape index: {1}]  }
   0x1   :  { %12 = vsyncpa [#allocation5], 0 }
   0x2   :  { %13 = vsyncpa [#allocation8], 0  ;;  %s1449_s18 = smov [#allocation3]   ;;  %s1377_s22 = scalar_lea.hbm %s1683_s1, 2048 }
   0x3   :  { %s21_s19 = sshll.u32 %s1449_s18, 4  ;;  %p1378_p0 = scmp.ne.s32.totalorder %s1683_s1, %s1377_s22  ;;  %s22_s19 = int_to_ptr.vmem [resolvable:$true] %s21_s19 }
   0x4   :  { %p1381_p1 = scmp.lt.u32.totalorder %s1377_s22, %s1683_s1 }
   0x6   :  { %p1383_p2 = pnand %p1381_p1, %p1378_p0 }
   0x8   :  { %1386 = shalt.err (!%p1383_p2)
}
   0x9   :  { %s1387_s27 = scalar_lea.vmem %s22_s19, 2048  ;;  %p1392_p4 = scmp.lt.s32.totalorder %s22_s19, %s22_s19 }
   0xa   :  { %p1388_p3 = scmp.ne.s32.totalorder %s22_s19, %s1387_s27  ;;  %p1393_p5 = scmp.lt.s32.totalorder %s1387_s27, %s1387_s27 }
   0xc   :  { %p1394_p6 = por %p1393_p5, %p1392_p4 }
   0xe   :  { %p1395_p7 = pnand %p1394_p6, %p1388_p3 }
  0x10   :  { %1398 = shalt.err (!%p1395_p7)
}
  0x11   :  { %s1450_s28 = smov 128   ;;  %s1451_s29 = smov 8  }
  0x12   :  { %27 = dma.hbm_to_vmem [thread:$0]  %s1683_s1, 2048, %s22_s19, [#allocation4], %s1450_s28, %s1450_s28, %s1451_s29  }
  0x13   :  { %1443 = dma.done.wait [#allocation4], 2048  }
  0x14   :  { %1444 = vsyncadd [#allocation4], 4294965248  ;;  %v1452_v0 = vmov 0   ;;  %v35_v1 = vld [vmem:[%s1682_s0] sm:$0xff]  ;;  %v94_v3 = vld [vmem:[#allocation3 + $0x8] sm:$0xff]  ;;  %v43_v27 = vlaneseq  ;;  %v1453_v30 = vmov 1.0  }
  0x15   :  { %1311 = vset.pattern.permute.xlu0 %v1452_v0  ;;  %1312 = vset.pattern.permute.xlu1 %v1452_v0  ;;  %v93_v2 = vld [vmem:[#allocation3] sm:$0xff]  ;;  %v95_v4 = vld [vmem:[#allocation3 + $0x10] sm:$0xff]  ;;  %v96_v5 = vld [vmem:[#allocation3 + $0x18] sm:$0xff]  ;;  %s1454_s12 = smov 64   ;;  %s1455_s13 = smov 32   ;;  %v1456_v49 = vmov 0.0|0.0  }
  0x16   :  { %46 = vperm.xlu0 %1311, %v35_v1   ;;  %v36_v6 = vld [vmem:[%s1682_s0 + $0x8] sm:$0xff]  ;;  %v1224_v7 = vpack.c.bf16 %v94_v3, %v93_v2  ;;  %v1228_v8 = vpack.c.bf16 %v96_v5, %v95_v4  ;;  %v97_v9 = vld [vmem:[#allocation3 + $0x20] sm:$0xff]  ;;  %v99_v12 = vld [vmem:[#allocation3 + $0x30] sm:$0xff]  ;;  %v1510_v28 = vand.u32 127, %v43_v27  ;;  %1256 = vmatprep.subr.bf16.mxu1 %v1456_v49  ;;  %vm1457_vm2 = vmmov 0   ;;  %s1460_s7 = smov [#allocation7]  }
  0x17   :  { %v98_v10 = vld [vmem:[#allocation3 + $0x28] sm:$0xff]  ;;  %v100_v13 = vld [vmem:[#allocation3 + $0x38] sm:$0xff]  ;;  %v101_v15 = vld [vmem:[#allocation3 + $0x40] sm:$0xff]  ;;  %v1458_v52 = vmov 0.0   ;;  %vm263_vm3 = vcmask 261120   ;;  %s999_s8 = sshll.u32 %s1460_s7, 4  ;;  %s1000_s8 = int_to_ptr.vmem [resolvable:$true] %s999_s8 }
  0x18   :  { %1225 = vmatprep.subr.bf16.mxu0 %v1224_v7  ;;  %v1232_v11 = vpack.c.bf16 %v98_v10, %v97_v9  ;;  %v1236_v14 = vpack.c.bf16 %v100_v13, %v99_v12  ;;  %v102_v16 = vld [vmem:[#allocation3 + $0x48] sm:$0xff]  ;;  %v103_v18 = vld [vmem:[#allocation3 + $0x50] sm:$0xff]  ;;  %v104_v19 = vld [vmem:[#allocation3 + $0x58] sm:$0xff]  ;;  %1155 = vmatprep.mubr.msk.f32.mxu1 %vm1457_vm2, %v1458_v52  ;;  %s1399_s9 = scalar_lea.vmem %s1000_s8, 128  ;;  %p1404_p9 = scmp.lt.s32.totalorder %s1000_s8, %s1000_s8 }
  0x19   :  { %1227 = vmatpush3.bf16.msra.mxu0 %v1224_v7  ;;  %v1240_v17 = vpack.c.bf16 %v102_v16, %v101_v15  ;;  %v1244_v20 = vpack.c.bf16 %v104_v19, %v103_v18  ;;  %v105_v21 = vld [vmem:[#allocation3 + $0x60] sm:$0xff]  ;;  %v106_v22 = vld [vmem:[#allocation3 + $0x68] sm:$0xff]  ;;  %v107_v24 = vld [vmem:[#allocation3 + $0x70] sm:$0xff]  ;;  %p1400_p8 = scmp.ne.s32.totalorder %s1000_s8, %s1399_s9  ;;  %p1405_p10 = scmp.lt.s32.totalorder %s1399_s9, %s1399_s9 }
  0x1a   :  { %49 = vperm.xlu0 %1311, %v36_v6   ;;  %1229 = vmatprep.subr.bf16.mxu0 %v1228_v8  ;;  %v1248_v23 = vpack.c.bf16 %v106_v22, %v105_v21  ;;  %v108_v25 = vld [vmem:[#allocation3 + $0x78] sm:$0xff]  ;;  %v1519_v32 = vld [vmem:[%s1685_s3] ss:$0 sm:$0xff]  ;;  %v230_v47 = vld [vmem:[%s1684_s2 + $0x8] sm:$0xff] }
  0x1b   :  { %v1252_v26 = vpack.c.bf16 %v108_v25, %v107_v24  ;;  %v229_v46 = vld [vmem:[%s1684_s2] sm:$0xff]  ;;  %v231_v48 = vld [vmem:[%s1684_s2 + $0x10] sm:$0xff]  ;;  %v232_v51 = vld [vmem:[%s1684_s2 + $0x18] sm:$0xff]  ;;  %p1406_p11 = por %p1405_p10, %p1404_p9 }
  0x1c   :  { %v1534_v50 = vpack.c.bf16 %v230_v47, %v229_v46  ;;  %v1543_v53 = vpack.c.bf16 %v232_v51, %v231_v48  ;;  %v37_v5 = vld [vmem:[%s1682_s0 + $0x10] sm:$0xff]  ;;  %v38_v10 = vld [vmem:[%s1682_s0 + $0x18] sm:$0xff] }
  0x1d   :  { %1231 = vmatpush3.bf16.msra.mxu0 %v1228_v8  ;;  %p1407_p12 = pnand %p1406_p11, %p1400_p8 }
  0x1e   :  { %1233 = vmatprep.subr.bf16.mxu0 %v1232_v11  ;;  %1258 = vmatpush3.bf16.msra.mxu1 %v1534_v50 }
  0x1f   :  { %1259 = vmatprep.subr.bf16.mxu1 %v1456_v49 }
  0x21   :  { %1235 = vmatpush3.bf16.msra.mxu0 %v1232_v11 }
  0x22   :  { %1237 = vmatprep.subr.bf16.mxu0 %v1236_v14  ;;  %1261 = vmatpush3.bf16.msra.mxu1 %v1543_v53 }
  0x23   :  { %1262 = vmatprep.subr.bf16.mxu1 %v1456_v49 }
  0x25   :  { %1239 = vmatpush3.bf16.msra.mxu0 %v1236_v14 }
  0x26   :  { %1241 = vmatprep.subr.bf16.mxu0 %v1240_v17 }
  0x29   :  { %1243 = vmatpush3.bf16.msra.mxu0 %v1240_v17 }
  0x2a   :  { %1245 = vmatprep.subr.bf16.mxu0 %v1244_v20 }
  0x2d   :  { %1247 = vmatpush3.bf16.msra.mxu0 %v1244_v20 }
  0x2e   :  { %1249 = vmatprep.subr.bf16.mxu0 %v1248_v23 }
  0x31   :  { %1251 = vmatpush3.bf16.msra.mxu0 %v1248_v23 }
  0x32   :  { %1253 = vmatprep.subr.bf16.mxu0 %v1252_v26 }
  0x35   :  { %1255 = vmatpush3.bf16.msra.mxu0 %v1252_v26 }
  0x36   :  { %1286 = vmatprep.subr.bf16.mxu0 %v1456_v49 }
  0x95   :  { %v47_v29 = vpop.permute.xlu0 %46 }
  0x96   :  { %vm69_vm0 = vcmp.eq.s32.totalorder %v1510_v28, %v47_v29 }
  0x97   :  { %1135 = vmatprep.mubr.msk.f32.mxu0 %vm69_vm0, %v1453_v30 }
  0x99   :  { %v50_v31 = vpop.permute.xlu0 %49 }
  0x9a   :  { %vm70_vm1 = vcmp.eq.s32.totalorder %v1510_v28, %v50_v31 }
  0x9b   :  { %1136 = vmatmul.mubr.msk.f32.vlgmr.msra.gmra.mrb[0].mxu0 %vm70_vm1, %v1453_v30 }
  0x9c   :  { %1288 = vmatpush3.bf16.msra.mxu0 %v1534_v50 }
  0x9d   :  { %1289 = vmatprep.subr.bf16.mxu0 %v1456_v49 }
  0xa0   :  { %1291 = vmatpush3.bf16.msra.mxu0 %v1543_v53 }
 0x16e   :  { %v1137_v33 = vpop.f32.mrb[0].mxu0 }
 0x16f   :  { %v182_v34 = vpop.f32.mrb[1].mxu0  ;;  %v188_v58 = vadd.f32 %v1137_v33, %v1519_v32 }
 0x170   :  { %v183_v35 = vadd.f32 %v1519_v32, %v182_v34 }
 0x172   :  { %1313 = vtanh.f32 %v183_v35  ;;  %v1029_v37 = vmul.f32 -1.442695, %v183_v35 }
 0x174   :  { %1315 = vpow2.f32 %v1029_v37 }
 0x17c   :  { %v1314_v36 = vpop.eup %1313 }
 0x17d   :  { %243 = vrot.lane.b32.xlu1 %v1314_v36, %s1454_s12 }
 0x17e   :  { %v1316_v38 = vpop.eup %1315 }
 0x17f   :  { %v237_v39 = vadd.f32 1.0, %v1316_v38 }
 0x181   :  { %1317 = vrcp.f32 %v237_v39 }
 0x18b   :  { %v1318_v40 = vpop.eup %1317 }
 0x18c   :  { %v241_v43 = vmul.f32 0.0, %v1318_v40 }
 0x1ef   :  { %v244_v41 = vpop.permute.xlu1 %243 }
 0x1f0   :  { %v246_v42 = vmul.f32 %v1318_v40, %v244_v41 }
 0x1f2   :  { %248 = vrot.lane.b32.xlu1 %v246_v42, %s1455_s13 }
 0x264   :  { %v249_v44 = vpop.permute.xlu1 %248 }
 0x265   :  { %v251_v45 = vadd.f32 %v249_v44, %v241_v43 }
 0x267   :  { %1319 = vtanh.f32 %v251_v45 }
 0x271   :  { %v1320_v54 = vpop.eup %1319 }
 0x272   :  { %254 = vrot.lane.b32.xlu0 %v1320_v54, %s1454_s12  ;;  %v39_v54 = vld [vmem:[%s1682_s0 + $0x20] sm:$0xff] }
 0x2e4   :  { %v255_v55 = vpop.permute.xlu0 %254 }
 0x2e5   :  { %v257_v56 = vmul.f32 %v1318_v40, %v255_v55 }
 0x2e7   :  { %261 = vrot.lane.b32.xlu1 %v257_v56, %s1455_s13 }
 0x359   :  { %v262_v57 = vpop.permute.xlu1 %261 }
 0x35a   :  { %1156 = vmatmul.mubr.msk.f32.vlgmr.msra.gmra.mrb[0].mxu1 %vm263_vm3, %v262_v57 }
 0x35b   :  { %1264 = vmatpush3.bf16.msra.mxu1 %v1534_v50  ;;  %1166 = vmatprep.mubr.msk.f32.mxu1 %vm1457_vm2, %v1458_v52 }
 0x35c   :  { %1265 = vmatprep.subr.bf16.mxu1 %v1456_v49 }
 0x35f   :  { %1267 = vmatpush3.bf16.msra.mxu1 %v1543_v53 }
 0x360   :  { %1268 = vmatprep.subr.bf16.mxu1 %v1456_v49 }
 0x42d   :  { %v332_v59 = vpop.f32.mrb[0].mxu1 }
 0x42e   :  { %v336_v60 = vadd.f32 %v332_v59, %v188_v58  ;;  %v1157_v61 = vpop.f32.mrb[1].mxu1  ;;  %v40_v59 = vld [vmem:[%s1682_s0 + $0x28] sm:$0xff] }
 0x430   :  { %1321 = vtanh.f32 %v336_v60  ;;  %v1031_v63 = vmul.f32 -1.442695, %v336_v60 }
 0x432   :  { %1323 = vpow2.f32 %v1031_v63 }
 0x43a   :  { %v1322_v62 = vpop.eup %1321 }
 0x43b   :  { %346 = vrot.lane.b32.xlu0 %v1322_v62, %s1454_s12 }
 0x43c   :  { %v1324_v0 = vpop.eup %1323 }
 0x43d   :  { %v340_v1 = vadd.f32 1.0, %v1324_v0 }
 0x43f   :  { %1325 = vrcp.f32 %v340_v1 }
 0x449   :  { %v1326_v2 = vpop.eup %1325 }
 0x44a   :  { %v344_v6 = vmul.f32 %v1326_v2, %v251_v45 }
 0x4ad   :  { %v347_v3 = vpop.permute.xlu0 %346 }
 0x4ae   :  { %v349_v4 = vmul.f32 %v1326_v2, %v347_v3 }
 0x4b0   :  { %351 = vrot.lane.b32.xlu1 %v349_v4, %s1455_s13 }
 0x4b4   :  { %52 = vperm.xlu1 %1312, %v37_v5  }
 0x522   :  { %v352_v7 = vpop.permute.xlu1 %351 }
 0x523   :  { %v354_v8 = vadd.f32 %v352_v7, %v344_v6 }
 0x525   :  { %1327 = vtanh.f32 %v354_v8 }
 0x52f   :  { %v1328_v9 = vpop.eup %1327 }
 0x530   :  { %357 = vrot.lane.b32.xlu0 %v1328_v9, %s1454_s12 }
 0x533   :  { %v53_v11 = vpop.permute.xlu1 %52 }
 0x534   :  { %55 = vperm.xlu0 %1311, %v38_v10   ;;  %vm71_vm4 = vcmp.eq.s32.totalorder %v1510_v28, %v53_v11 }
 0x535   :  { %1138 = vmatprep.mubr.msk.f32.mxu0 %vm71_vm4, %v1453_v30 }
 0x5a2   :  { %v358_v12 = vpop.permute.xlu0 %357 }
 0x5a3   :  { %v360_v13 = vmul.f32 %v1326_v2, %v358_v12 }
 0x5a5   :  { %364 = vrot.lane.b32.xlu1 %v360_v13, %s1455_s13 }
 0x5b3   :  { %v56_v14 = vpop.permute.xlu0 %55 }
 0x5b4   :  { %vm72_vm5 = vcmp.eq.s32.totalorder %v1510_v28, %v56_v14 }
 0x5b5   :  { %1139 = vmatmul.mubr.msk.f32.gmra.mrb[2].mxu0 %vm72_vm5, %v1453_v30 }
 0x617   :  { %v365_v15 = vpop.permute.xlu1 %364 }
 0x618   :  { %1167 = vmatmul.mubr.msk.f32.vlgmr.msra.gmra.mrb[2].mxu1 %vm263_vm3, %v365_v15 }
 0x619   :  { %1270 = vmatpush3.bf16.msra.mxu1 %v1534_v50  ;;  %1177 = vmatprep.mubr.msk.f32.mxu1 %vm1457_vm2, %v1458_v52 }
 0x61a   :  { %1271 = vmatprep.subr.bf16.mxu1 %v1456_v49 }
 0x61d   :  { %1273 = vmatpush3.bf16.msra.mxu1 %v1543_v53 }
 0x61e   :  { %1274 = vmatprep.subr.bf16.mxu1 %v1456_v49 }
 0x688   :  { %v1140_v16 = vpop.f32.mrb[2].mxu0 }
 0x689   :  { %v192_v17 = vpop.f32.mrb[3].mxu0  ;;  %v198_v39 = vadd.f32 %v1140_v16, %v1519_v32 }
 0x68a   :  { %v193_v18 = vadd.f32 %v1519_v32, %v192_v17 }
 0x6eb   :  { %v434_v19 = vpop.f32.mrb[2].mxu1 }
 0x6ec   :  { %v438_v20 = vadd.f32 %v434_v19, %v193_v18  ;;  %v1168_v21 = vpop.f32.mrb[3].mxu1 }
 0x6ee   :  { %1329 = vtanh.f32 %v438_v20  ;;  %v1033_v23 = vmul.f32 -1.442695, %v438_v20 }
 0x6f0   :  { %1331 = vpow2.f32 %v1033_v23 }
 0x6f8   :  { %v1330_v22 = vpop.eup %1329 }
 0x6f9   :  { %448 = vrot.lane.b32.xlu0 %v1330_v22, %s1454_s12 }
 0x6fa   :  { %v1332_v24 = vpop.eup %1331 }
 0x6fb   :  { %v442_v25 = vadd.f32 1.0, %v1332_v24 }
 0x6fd   :  { %1333 = vrcp.f32 %v442_v25 }
 0x707   :  { %v1334_v26 = vpop.eup %1333 }
 0x708   :  { %v446_v31 = vmul.f32 %v1334_v26, %v354_v8 }
 0x76b   :  { %v449_v27 = vpop.permute.xlu0 %448 }
 0x76c   :  { %v451_v29 = vmul.f32 %v1334_v26, %v449_v27 }
 0x76e   :  { %453 = vrot.lane.b32.xlu1 %v451_v29, %s1455_s13 }
 0x7e0   :  { %v454_v33 = vpop.permute.xlu1 %453 }
 0x7e1   :  { %v456_v34 = vadd.f32 %v454_v33, %v446_v31 }
 0x7e3   :  { %1335 = vtanh.f32 %v456_v34 }
 0x7ed   :  { %v1336_v35 = vpop.eup %1335 }
 0x7ee   :  { %459 = vrot.lane.b32.xlu0 %v1336_v35, %s1454_s12 }
 0x860   :  { %v460_v36 = vpop.permute.xlu0 %459 }
 0x861   :  { %v462_v37 = vmul.f32 %v1334_v26, %v460_v36 }
 0x863   :  { %466 = vrot.lane.b32.xlu1 %v462_v37, %s1455_s13  ;;  %v42_v37 = vld [vmem:[%s1682_s0 + $0x38] sm:$0xff] }
 0x8d5   :  { %v467_v38 = vpop.permute.xlu1 %466 }
 0x8d6   :  { %1178 = vmatmul.mubr.msk.f32.vlgmr.msra.gmra.mrb[4].mxu1 %vm263_vm3, %v467_v38 }
 0x8d7   :  { %1276 = vmatpush3.bf16.msra.mxu1 %v1534_v50  ;;  %1188 = vmatprep.mubr.msk.f32.mxu1 %vm1457_vm2, %v1458_v52 }
 0x8d8   :  { %1277 = vmatprep.subr.bf16.mxu1 %v1456_v49 }
 0x8db   :  { %1279 = vmatpush3.bf16.msra.mxu1 %v1543_v53 }
 0x8dc   :  { %1280 = vmatprep.subr.bf16.mxu1 %v1456_v49 }
 0x9a9   :  { %v536_v40 = vpop.f32.mrb[4].mxu1 }
 0x9aa   :  { %v540_v41 = vadd.f32 %v536_v40, %v198_v39  ;;  %v1179_v42 = vpop.f32.mrb[5].mxu1 }
 0x9ac   :  { %1337 = vtanh.f32 %v540_v41  ;;  %v1035_v44 = vmul.f32 -1.442695, %v540_v41 }
 0x9ae   :  { %1339 = vpow2.f32 %v1035_v44 }
 0x9b6   :  { %v1338_v43 = vpop.eup %1337 }
 0x9b7   :  { %550 = vrot.lane.b32.xlu0 %v1338_v43, %s1454_s12 }
 0x9b8   :  { %v1340_v45 = vpop.eup %1339 }
 0x9b9   :  { %v544_v46 = vadd.f32 1.0, %v1340_v45 }
 0x9bb   :  { %1341 = vrcp.f32 %v544_v46 }
 0x9c5   :  { %v1342_v47 = vpop.eup %1341 }
 0x9c6   :  { %v548_v55 = vmul.f32 %v1342_v47, %v456_v34 }
 0xa29   :  { %v551_v48 = vpop.permute.xlu0 %550 }
 0xa2a   :  { %v553_v51 = vmul.f32 %v1342_v47, %v551_v48 }
 0xa2c   :  { %555 = vrot.lane.b32.xlu1 %v553_v51, %s1455_s13 }
 0xa30   :  { %58 = vperm.xlu1 %1312, %v39_v54  }
 0xa9e   :  { %v556_v56 = vpop.permute.xlu1 %555 }
 0xa9f   :  { %v558_v57 = vadd.f32 %v556_v56, %v548_v55 }
 0xaa1   :  { %1343 = vtanh.f32 %v558_v57 }
 0xaab   :  { %v1344_v58 = vpop.eup %1343 }
 0xaac   :  { %561 = vrot.lane.b32.xlu0 %v1344_v58, %s1454_s12 }
 0xaaf   :  { %v59_v60 = vpop.permute.xlu1 %58 }
 0xab0   :  { %vm73_vm6 = vcmp.eq.s32.totalorder %v1510_v28, %v59_v60  ;;  %61 = vperm.xlu0 %1311, %v40_v59  }
 0xab1   :  { %1141 = vmatprep.mubr.msk.f32.mxu0 %vm73_vm6, %v1453_v30 }
 0xb1e   :  { %v562_v61 = vpop.permute.xlu0 %561 }
 0xb1f   :  { %v564_v62 = vmul.f32 %v1342_v47, %v562_v61 }
 0xb21   :  { %568 = vrot.lane.b32.xlu1 %v564_v62, %s1455_s13 }
 0xb2f   :  { %v62_v63 = vpop.permute.xlu0 %61 }
 0xb30   :  { %vm74_vm7 = vcmp.eq.s32.totalorder %v1510_v28, %v62_v63 }
 0xb31   :  { %1142 = vmatmul.mubr.msk.f32.gmra.mrb[4].mxu0 %vm74_vm7, %v1453_v30 }
 0xb93   :  { %v569_v0 = vpop.permute.xlu1 %568 }
 0xb94   :  { %1189 = vmatmul.mubr.msk.f32.vlgmr.msra.gmra.mrb[6].mxu1 %vm263_vm3, %v569_v0 }
 0xb95   :  { %1282 = vmatpush3.bf16.msra.mxu1 %v1534_v50  ;;  %1199 = vmatprep.mubr.msk.f32.mxu1 %vm1457_vm2, %v1458_v52 }
 0xb96   :  { %1283 = vmatprep.subr.bf16.mxu1 %v1456_v49 }
 0xb99   :  { %1285 = vmatpush3.bf16.msra.mxu1 %v1543_v53 }
 0xb9a   :  { %1292 = vmatprep.subr.bf16.mxu1 %v1456_v49 }
 0xc04   :  { %v1143_v1 = vpop.f32.mrb[4].mxu0 }
 0xc05   :  { %v202_v2 = vpop.f32.mrb[5].mxu0  ;;  %v208_v21 = vadd.f32 %v1143_v1, %v1519_v32 }
 0xc06   :  { %v203_v3 = vadd.f32 %v1519_v32, %v202_v2 }
 0xc67   :  { %v638_v4 = vpop.f32.mrb[6].mxu1 }
 0xc68   :  { %v642_v5 = vadd.f32 %v638_v4, %v203_v3  ;;  %v1190_v6 = vpop.f32.mrb[7].mxu1 }
 0xc6a   :  { %1345 = vtanh.f32 %v642_v5  ;;  %v1037_v8 = vmul.f32 -1.442695, %v642_v5 }
 0xc6c   :  { %1347 = vpow2.f32 %v1037_v8 }
 0xc74   :  { %v1346_v7 = vpop.eup %1345 }
 0xc75   :  { %652 = vrot.lane.b32.xlu0 %v1346_v7, %s1454_s12 }
 0xc76   :  { %v1348_v9 = vpop.eup %1347 }
 0xc77   :  { %v646_v10 = vadd.f32 1.0, %v1348_v9 }
 0xc79   :  { %1349 = vrcp.f32 %v646_v10 }
 0xc83   :  { %v1350_v11 = vpop.eup %1349 }
 0xc84   :  { %v650_v14 = vmul.f32 %v1350_v11, %v558_v57 }
 0xce7   :  { %v653_v12 = vpop.permute.xlu0 %652 }
 0xce8   :  { %v655_v13 = vmul.f32 %v1350_v11, %v653_v12 }
 0xcea   :  { %657 = vrot.lane.b32.xlu1 %v655_v13, %s1455_s13 }
 0xd5c   :  { %v658_v15 = vpop.permute.xlu1 %657 }
 0xd5d   :  { %v660_v16 = vadd.f32 %v658_v15, %v650_v14 }
 0xd5f   :  { %1351 = vtanh.f32 %v660_v16 }
 0xd69   :  { %v1352_v17 = vpop.eup %1351 }
 0xd6a   :  { %663 = vrot.lane.b32.xlu0 %v1352_v17, %s1454_s12 }
 0xddc   :  { %v664_v18 = vpop.permute.xlu0 %663 }
 0xddd   :  { %v666_v19 = vmul.f32 %v1350_v11, %v664_v18 }
 0xddf   :  { %670 = vrot.lane.b32.xlu1 %v666_v19, %s1455_s13 }
 0xe51   :  { %v671_v20 = vpop.permute.xlu1 %670 }
 0xe52   :  { %1200 = vmatmul.mubr.msk.f32.vlgmr.msra.gmra.mrb[8].mxu1 %vm263_vm3, %v671_v20 }
 0xe53   :  { %1294 = vmatpush3.bf16.msra.mxu1 %v1534_v50  ;;  %1221 = vmatprep.mubr.msk.f32.mxu1 %vm1457_vm2, %v1458_v52 }
 0xe54   :  { %1295 = vmatprep.subr.bf16.mxu1 %v1456_v49  ;;  %v41_v49 = vld [vmem:[%s1682_s0 + $0x30] sm:$0xff]  ;;  %s1459_s0 = smov 96  }
 0xe57   :  { %1297 = vmatpush3.bf16.msra.mxu1 %v1543_v53 }
 0xf25   :  { %v740_v22 = vpop.f32.mrb[8].mxu1 }
 0xf26   :  { %v744_v23 = vadd.f32 %v740_v22, %v208_v21  ;;  %v1201_v24 = vpop.f32.mrb[9].mxu1 }
 0xf28   :  { %1353 = vtanh.f32 %v744_v23  ;;  %v1039_v26 = vmul.f32 -1.442695, %v744_v23 }
 0xf2a   :  { %1355 = vpow2.f32 %v1039_v26 }
 0xf32   :  { %v1354_v25 = vpop.eup %1353 }
 0xf33   :  { %754 = vrot.lane.b32.xlu0 %v1354_v25, %s1454_s12 }
 0xf34   :  { %v1356_v27 = vpop.eup %1355 }
 0xf35   :  { %v748_v50 = vadd.f32 1.0, %v1356_v27 }
 0xf37   :  { %1357 = vrcp.f32 %v748_v50 }
 0xf41   :  { %v1358_v29 = vpop.eup %1357 }
 0xf42   :  { %v752_v53 = vmul.f32 %v1358_v29, %v660_v16 }
 0xfa5   :  { %v755_v31 = vpop.permute.xlu0 %754 }
 0xfa6   :  { %v757_v33 = vmul.f32 %v1358_v29, %v755_v31 }
 0xfa8   :  { %759 = vrot.lane.b32.xlu1 %v757_v33, %s1455_s13 }
 0xfac   :  { %64 = vperm.xlu1 %1312, %v41_v49  }
0x101a   :  { %v760_v34 = vpop.permute.xlu1 %759 }
0x101b   :  { %v762_v35 = vadd.f32 %v760_v34, %v752_v53 }
0x101d   :  { %1359 = vtanh.f32 %v762_v35 }
0x1027   :  { %v1360_v36 = vpop.eup %1359 }
0x1028   :  { %765 = vrot.lane.b32.xlu0 %v1360_v36, %s1454_s12 }
0x102b   :  { %v65_v38 = vpop.permute.xlu1 %64 }
0x102c   :  { %vm75_vm8 = vcmp.eq.s32.totalorder %v1510_v28, %v65_v38  ;;  %67 = vperm.xlu0 %1311, %v42_v37  }
0x102d   :  { %1144 = vmatprep.mubr.msk.f32.mxu0 %vm75_vm8, %v1453_v30 }
0x109a   :  { %v766_v39 = vpop.permute.xlu0 %765 }
0x109b   :  { %v768_v40 = vmul.f32 %v1358_v29, %v766_v39 }
0x109d   :  { %772 = vrot.lane.b32.xlu1 %v768_v40, %s1455_s13 }
0x10ab   :  { %v68_v41 = vpop.permute.xlu0 %67 }
0x10ac   :  { %vm76_vm9 = vcmp.eq.s32.totalorder %v1510_v28, %v68_v41 }
0x10ad   :  { %1145 = vmatmul.mubr.msk.f32.gmra.mrb[6].mxu0 %vm76_vm9, %v1453_v30 }
0x10ae   :  { %1210 = vmatprep.mubr.msk.f32.mxu0 %vm1457_vm2, %v1458_v52 }
0x110f   :  { %v773_v42 = vpop.permute.xlu1 %772 }
0x1110   :  { %1211 = vmatmul.mubr.msk.f32.vlgmr.msra.gmra.mrb[8].mxu0 %vm263_vm3, %v773_v42 }
0x1180   :  { %v1146_v43 = vpop.f32.mrb[6].mxu0 }
0x1181   :  { %v212_v44 = vpop.f32.mrb[7].mxu0  ;;  %v218_v0 = vadd.f32 %v1146_v43, %v1519_v32 }
0x1182   :  { %v213_v45 = vadd.f32 %v1519_v32, %v212_v44 }
0x11e3   :  { %v842_v46 = vpop.f32.mrb[8].mxu0 }
0x11e4   :  { %v846_v47 = vadd.f32 %v842_v46, %v213_v45  ;;  %v1212_v48 = vpop.f32.mrb[9].mxu0 }
0x11e6   :  { %1361 = vtanh.f32 %v846_v47  ;;  %v1041_v28 = vmul.f32 -1.442695, %v846_v47 }
0x11e8   :  { %1363 = vpow2.f32 %v1041_v28 }
0x11f0   :  { %v1362_v51 = vpop.eup %1361 }
0x11f1   :  { %856 = vrot.lane.b32.xlu0 %v1362_v51, %s1454_s12 }
0x11f2   :  { %v1364_v30 = vpop.eup %1363 }
0x11f3   :  { %v850_v54 = vadd.f32 1.0, %v1364_v30 }
0x11f5   :  { %1365 = vrcp.f32 %v850_v54 }
0x11ff   :  { %v1366_v52 = vpop.eup %1365 }
0x1200   :  { %v854_v57 = vmul.f32 %v1366_v52, %v762_v35 }
0x1263   :  { %v857_v55 = vpop.permute.xlu0 %856 }
0x1264   :  { %v859_v56 = vmul.f32 %v1366_v52, %v857_v55 }
0x1266   :  { %861 = vrot.lane.b32.xlu1 %v859_v56, %s1455_s13 }
0x12d8   :  { %v862_v58 = vpop.permute.xlu1 %861 }
0x12d9   :  { %v864_v59 = vadd.f32 %v862_v58, %v854_v57 }
0x12db   :  { %1367 = vtanh.f32 %v864_v59 }
0x12e5   :  { %v1368_v60 = vpop.eup %1367 }
0x12e6   :  { %867 = vrot.lane.b32.xlu0 %v1368_v60, %s1454_s12 }
0x1358   :  { %v868_v61 = vpop.permute.xlu0 %867 }
0x1359   :  { %v870_v62 = vmul.f32 %v1366_v52, %v868_v61 }
0x135b   :  { %874 = vrot.lane.b32.xlu1 %v870_v62, %s1455_s13 }
0x13cd   :  { %v875_v63 = vpop.permute.xlu1 %874 }
0x13ce   :  { %1222 = vmatmul.mubr.msk.f32.vlgmr.msra.gmra.mrb[10].mxu1 %vm263_vm3, %v875_v63 }
0x14a1   :  { %v944_v1 = vpop.f32.mrb[10].mxu1 }
0x14a2   :  { %v948_v2 = vadd.f32 %v944_v1, %v218_v0  ;;  %v1223_v3 = vpop.f32.mrb[11].mxu1 }
0x14a4   :  { %1369 = vtanh.f32 %v948_v2  ;;  %v1043_v5 = vmul.f32 -1.442695, %v948_v2 }
0x14a6   :  { %1371 = vpow2.f32 %v1043_v5 }
0x14ae   :  { %v1370_v4 = vpop.eup %1369 }
0x14af   :  { %958 = vrot.lane.b32.xlu0 %v1370_v4, %s1454_s12 }
0x14b0   :  { %v1372_v6 = vpop.eup %1371 }
0x14b1   :  { %v952_v7 = vadd.f32 1.0, %v1372_v6 }
0x14b3   :  { %1373 = vrcp.f32 %v952_v7 }
0x14bd   :  { %v1374_v8 = vpop.eup %1373 }
0x14be   :  { %v956_v11 = vmul.f32 %v1374_v8, %v864_v59 }
0x1521   :  { %v959_v9 = vpop.permute.xlu0 %958 }
0x1522   :  { %v961_v10 = vmul.f32 %v1374_v8, %v959_v9 }
0x1524   :  { %963 = vrot.lane.b32.xlu1 %v961_v10, %s1455_s13 }
0x1596   :  { %v964_v12 = vpop.permute.xlu1 %963 }
0x1597   :  { %v966_v32 = vadd.f32 %v964_v12, %v956_v11 }
0x1599   :  { %1375 = vtanh.f32 %v966_v32 }
0x15a3   :  { %v1376_v13 = vpop.eup %1375 }
0x15a4   :  { %969 = vrot.lane.b32.xlu0 %v1376_v13, %s1454_s12 }
0x15a8   :  { %979 = vrot.lane.b32.xlu0 %v966_v32, %s1459_s0 }
0x1616   :  { %v970_v14 = vpop.permute.xlu0 %969 }
0x1617   :  { %v972_v15 = vmul.f32 %v1374_v8, %v970_v14 }
0x1619   :  { %974 = vrot.lane.b32.xlu1 %v972_v15, %s1455_s13 }
0x161a   :  { %v980_v16 = vpop.permute.xlu0 %979 }
0x161b   :  { %982 = vst.msk [vmem:[#allocation7] sm:$0xff] %vm263_vm3, %v980_v16 }
0x161c   :  { %1410 = shalt.err (!%p1407_p12)
}
0x161d   :  { %s1411_s11 = scalar_lea.hbm %s1687_s5, 128 }
0x161e   :  { %p1412_p13 = scmp.ne.s32.totalorder %s1687_s5, %s1411_s11  ;;  %p1415_p0 = scmp.lt.u32.totalorder %s1411_s11, %s1687_s5 }
0x1620   :  { %p1417_p1 = pnand %p1415_p0, %p1412_p13 }
0x1622   :  { %1420 = shalt.err (!%p1417_p1)
}
0x1623   :  { %1002 = dma.vmem_to_hbm [thread:$0]  %s1000_s8, 128, %s1687_s5, [#allocation8]  }
0x1624   :  { %s1461_s17 = smov [#allocation6]  }
0x1625   :  { %s989_s18 = sshll.u32 %s1461_s17, 4  ;;  %s990_s18 = int_to_ptr.vmem [resolvable:$true] %s989_s18 }
0x1626   :  { %s1421_s19 = scalar_lea.vmem %s990_s18, 128  ;;  %p1426_p3 = scmp.lt.s32.totalorder %s990_s18, %s990_s18 }
0x1627   :  { %p1422_p2 = scmp.ne.s32.totalorder %s990_s18, %s1421_s19  ;;  %p1427_p4 = scmp.lt.s32.totalorder %s1421_s19, %s1421_s19 }
0x1629   :  { %p1428_p5 = por %p1427_p4, %p1426_p3 }
0x162b   :  { %p1429_p6 = pnand %p1428_p5, %p1422_p2 }
0x168b   :  { %v975_v17 = vpop.permute.xlu1 %974 }
0x168c   :  { %977 = vst.msk [vmem:[#allocation6] sm:$0xff] %vm263_vm3, %v975_v17 }
0x168d   :  { %1432 = shalt.err (!%p1429_p6)
}
0x168e   :  { %s1433_s21 = scalar_lea.hbm %s1686_s4, 128 }
0x168f   :  { %p1434_p7 = scmp.ne.s32.totalorder %s1686_s4, %s1433_s21  ;;  %p1437_p8 = scmp.lt.u32.totalorder %s1433_s21, %s1686_s4 }
0x1691   :  { %p1439_p9 = pnand %p1437_p8, %p1434_p7 }
0x1693   :  { %1442 = shalt.err (!%p1439_p9)
}
0x1694   :  { %992 = dma.vmem_to_hbm [thread:$0]  %s990_s18, 128, %s1686_s4, [#allocation5]  }
0x1695   :  { %1445 = dma.done.wait [#allocation5], 128  }
0x1696   :  { %1446 = vsyncadd [#allocation5], 4294967168 }
0x1697   :  { %1447 = dma.done.wait [#allocation8], 128  }
0x1698   :  { %1448 = vsyncadd [#allocation8], 4294967168 }
0x1699   :  { %1009 = vsyncpa [#allocation4], 1 }
0x169a   :  { %1010 = vsyncpa [#allocation5], 1 }
0x169b   :  { %1011 = vsyncpa [#allocation8], 1 }

</bundles_post_ra>
